<compile_context>
chip_gen: v7x
topology: tpu7x:2x2x1
jax: 0.10.0
libtpu: 0.0.40
codegen_flags: <defaults>
</compile_context>

<pallas_src>
import jax
import jax.numpy as jnp
from jax.experimental import pallas as pl
from jax.experimental.pallas import tpu as pltpu


# --------------------------------------------------------------------------- #
# Kernel body
# --------------------------------------------------------------------------- #
def _nlinear_kernel(x_ref, w_ref, b_ref, o_ref):
    # x_ref: (tb, g*d_in)          flat activations for g consecutive layers
    # w_ref: (1, g*d_in, g*d_out)  block-diagonal packed weights for the group
    # b_ref: (1, 1, g*d_out)       packed biases for the group
    # o_ref: (tb, g*d_out)         lane-dense output slab
    w = w_ref[0]                       # (g*d_in, g*d_out), contiguous load
    x = x_ref[...]                     # (tb, g*d_in)
    if x.dtype != w.dtype:
        # Feed the MXU matching (possibly low-precision) operands.
        x = x.astype(w.dtype)
    acc = jnp.dot(x, w, preferred_element_type=jnp.float32)   # f32 accumulate
    o_ref[...] = (acc + b_ref[0].astype(jnp.float32)).astype(o_ref.dtype)


# --------------------------------------------------------------------------- #
# Sizing helpers (generation / dtype aware)
# --------------------------------------------------------------------------- #
def _vmem_capacity():
    """Per-core VMEM bytes for this generation (64 MiB v7x, 128 MiB v5e/v6e)."""
    try:
        info = pltpu.get_tpu_info()
        cap = getattr(info, "vmem_capacity_bytes", None)
        if cap:
            return int(cap)
    except Exception:
        pass
    return 64 << 20  # conservative default (v7x per-core VMEM)


def _sublane_multiple(dtype):
    """Second-minor block-dim multiple: 8 for f32, 16 for bf16, 32 for int8/fp8."""
    return max(8, 32 // max(jnp.dtype(dtype).itemsize, 1))


def _choose_layer_group(n, d_in, d_out, w_itemsize, weight_budget):
    """Layers fused per grid step (g divides n).

    Legality for the flat x / out blocks (lane dim must be a multiple of 128
    or the full extent):
        x  block lane width  g*d_in  : % 128 == 0  or  g == n
        out block lane width g*d_out : % 128 == 0  or  g == n
    Preference: fill the 256-wide MXU (v6e/v7x) when the per-layer matmul is
    skinny — the block-diagonal zeros ride on otherwise-idle MXU area.  (On
    v5e's 128-wide MXU a 128 target would already suffice; the 256 target only
    costs a little extra weight traffic there.)  Keep the packed weight block
    within the per-step VMEM weight budget.
    """
    def legal(g):
        ok_in = (g * d_in) % 128 == 0 or g == n
        ok_out = (g * d_out) % 128 == 0 or g == n
        return ok_in and ok_out

    def wbytes(g):  # block-diagonal packed weight block for one group
        return g * d_in * g * d_out * w_itemsize

    cands = [g for g in range(1, n + 1) if n % g == 0 and legal(g)]
    fitting = [g for g in cands if wbytes(g) <= weight_budget]
    if not fitting:
        # Nothing fits the soft budget: take the cheapest legal group rather
        # than blindly returning n (avoids VMEM-OOM on v7x's 64 MiB).
        return min(cands, key=wbytes)
    for g in sorted(fitting):
        if g * d_in >= 256 and g * d_out >= 256:
            return g
    for g in sorted(fitting):
        if g * d_out >= 128:
            return g
    return max(fitting)


def _choose_batch_tile(B, bytes_per_row, row_budget, sublane):
    """Largest batch tile that fits the budget; full extent or a divisor of B
    that is a multiple of the (dtype-aware) sublane requirement."""
    max_rows = max(int(row_budget // max(bytes_per_row, 1)), 1)
    if B <= max_rows:
        return B  # full extent: always legal, no partial tiles
    cands = [t for t in range(sublane, min(B, max_rows) + 1, sublane) if B % t == 0]
    if cands:
        return max(cands)
    # No sublane-aligned divisor fits the budget: take the smallest legal
    # divisor so the footprint stays as small as possible.
    cands = [t for t in range(sublane, B, sublane) if B % t == 0]
    return min(cands) if cands else B


# --------------------------------------------------------------------------- #
# One-time parameter preparation (model-load time, not the hot path)
# --------------------------------------------------------------------------- #
def prepare_params(weights, biases, *, param_dtype=None, vmem_capacity_bytes=None):
    """weights: (n, d_out, d_in) PyTorch layout; biases: (n, d_out).

    Returns (w_packed, b_packed) where
        w_packed: (n//g, g*d_in, g*d_out)  block-diagonal per layer group
        b_packed: (n//g, 1, g*d_out)
    Optionally casts parameters to param_dtype (e.g. jnp.bfloat16) so the MXU
    runs native bf16 passes; accumulation stays f32 in the kernel.
    """
    n, d_out, d_in = weights.shape
    if param_dtype is not None:
        weights = weights.astype(param_dtype)
        biases = biases.astype(param_dtype)

    w_item = jnp.dtype(weights.dtype).itemsize
    cap = vmem_capacity_bytes or _vmem_capacity()
    weight_budget = min(max(int(cap * 0.8) // 4, 1 << 20), 16 << 20)

    g = _choose_layer_group(n, d_in, d_out, w_item, weight_budget)
    n_groups = n // g

    w_t = jnp.transpose(weights, (0, 2, 1))            # (n, d_in, d_out)
    w_g = w_t.reshape(n_groups, g, d_in, d_out)
    eye = jnp.eye(g, dtype=w_t.dtype)
    # Block-diagonal: rows indexed by (layer j, in-feature i), cols by
    # (layer h, out-feature o); non-zero only when j == h.
    w_blk = jnp.einsum("Ngio,gh->Ngiho", w_g, eye)
    w_packed = w_blk.reshape(n_groups, g * d_in, g * d_out)
    b_packed = biases.reshape(n_groups, 1, g * d_out)
    return w_packed, b_packed


# --------------------------------------------------------------------------- #
# Forward wrapper
# --------------------------------------------------------------------------- #
def nlinear_memory_efficient(x, w_packed, b_packed):
    """x: (B, n, d_in); (w_packed, b_packed) from prepare_params.
    Returns (B, n, d_out), matching
    torch.stack([l(x[:, i]) for i, l in enumerate(self.layers)], 1)."""
    B, n, d_in = x.shape
    n_groups, gdi, gdo = w_packed.shape
    g = gdi // d_in
    d_out = gdo // g
    assert gdi == g * d_in and gdo == g * d_out
    assert n == n_groups * g, "n must equal n_groups * g"
    assert b_packed.shape == (n_groups, 1, gdo)

    out_dtype = x.dtype
    x_item = jnp.dtype(x.dtype).itemsize
    w_item = jnp.dtype(w_packed.dtype).itemsize
    o_item = jnp.dtype(out_dtype).itemsize

    # --- generation-aware VMEM budgeting ---------------------------------- #
    cap = _vmem_capacity()
    budget = max(int(cap * 0.8) - (2 << 20), 8 << 20)   # headroom for scratch
    w_bytes = (gdi * gdo + gdo) * w_item                # weight + bias block
    row_bytes = gdi * x_item + gdo * o_item             # one batch row (x + out)
    # Pipeline double-buffers each operand; weights only change every B/tb steps
    # but budget them double-buffered as well for safety.
    row_budget = max(budget // 2 - w_bytes, row_bytes)
    tb = _choose_batch_tile(B, row_bytes, row_budget, _sublane_multiple(x.dtype))

    hard_cap = int(cap * 0.85)
    vmem_limit = 2 * (tb * row_bytes + w_bytes) + (4 << 20)
    vmem_limit = int(min(max(vmem_limit, min(32 << 20, hard_cap)), hard_cap))

    # --- core split: prefer sharding the layer-group axis (v7x 2-TC) so each
    #     core streams only its own weights; fall back to batch-parallel. ---- #
    dims = ("parallel", "arbitrary") if n_groups >= 2 else ("arbitrary", "parallel")

    cost = pl.CostEstimate(
        flops=2 * B * n * d_in * d_out,
        transcendentals=0,
        bytes_accessed=(B * n * d_in * x_item
                        + w_packed.size * w_item
                        + b_packed.size * w_item
                        + B * n * d_out * o_item),
    )

    x_flat = x.reshape(B, n * d_in)   # free, contiguous reshape — no transpose

    out_flat = pl.pallas_call(
        _nlinear_kernel,
        out_shape=jax.ShapeDtypeStruct((B, n * d_out), out_dtype),
        grid_spec=pltpu.PrefetchScalarGridSpec(
            num_scalar_prefetch=0,
            grid=(n_groups, pl.cdiv(B, tb)),   # batch fastest -> weight reuse
            in_specs=[
                # x: flat (B, n*d_in), lane-contiguous group slice, no transpose.
                pl.BlockSpec((tb, gdi), lambda ni, bi: (bi, ni)),
                # Weights/bias ignore the (fast) batch axis so their block
                # stays resident across all batch tiles of a layer group.
                pl.BlockSpec((1, gdi, gdo), lambda ni, bi: (ni, 0, 0)),
                pl.BlockSpec((1, 1, gdo), lambda ni, bi: (ni, 0, 0)),
            ],
            out_specs=pl.BlockSpec((tb, gdo), lambda ni, bi: (bi, ni)),
        ),
        compiler_params=pltpu.CompilerParams(
            dimension_semantics=dims,
            vmem_limit_bytes=vmem_limit,
        ),
        cost_estimate=cost,
    )(x_flat, w_packed, b_packed)

    # Contiguous split of the last axis: free reshape, no HBM transpose.
    return out_flat.reshape(B, n, d_out)


# --------------------------------------------------------------------------- #
# Self-test
# --------------------------------------------------------------------------- #
if __name__ == "__main__":
    # Small shapes consistent with the module: batch=2, n=4, d_in=16, d_out=32.
    B, n, d_in, d_out = 2, 4, 16, 32

    key = jax.random.PRNGKey(0)
    kx, kw, kb = jax.random.split(key, 3)

    x = jax.random.normal(kx, (B, n, d_in), dtype=jnp.float32)
    # Same shapes as n x nn.Linear(d_in, d_out) parameters (PyTorch layout).
    weights = jax.random.normal(kw, (n, d_out, d_in), dtype=jnp.float32) * 0.1
    biases = jax.random.normal(kb, (n, d_out), dtype=jnp.float32) * 0.1

    # One-time parameter prep (keep f32 here so the reference check is tight;
    # pass param_dtype=jnp.bfloat16 for the fast-MXU production path).
    w_packed, b_packed = prepare_params(weights, biases)

    out = nlinear_memory_efficient(x, w_packed, b_packed)
    out = jax.block_until_ready(out)

    # Reference check in plain JAX (same math as the PyTorch module).
    ref = jnp.stack(
        [x[:, i] @ weights[i].T + biases[i] for i in range(n)], axis=1
    )
    assert out.shape == (B, n, d_out)
    assert jnp.allclose(out, ref, atol=1e-5, rtol=1e-5)

    print("KERNEL_OK")
</pallas_src>

<mosaic_0001>
module attributes {stable_mosaic.version = 11 : i64} {
  func.func @_nlinear_kernel(%arg0: i32, %arg1: i32, %arg2: memref<2x64xf32, #tpu.memory_space<vmem>>, %arg3: memref<1x64x128xf32, #tpu.memory_space<vmem>>, %arg4: memref<1x1x128xf32, #tpu.memory_space<vmem>>, %arg5: memref<2x128xf32, #tpu.memory_space<vmem>>) attributes {dimension_semantics = [#tpu.dimension_semantics<arbitrary>, #tpu.dimension_semantics<parallel>], iteration_bounds = array<i64: 1, 1>, scalar_prefetch = 0 : i64, scratch_operands = 0 : i64, tpu.core_type = #tpu.core_type<tc>, window_params = [{transform_indices = @transform_0, window_bounds = array<i64: 2, 64>}, {transform_indices = @transform_1, window_bounds = array<i64: 1, 64, 128>}, {transform_indices = @transform_2, window_bounds = array<i64: 1, 1, 128>}, {transform_indices = @transform_3, window_bounds = array<i64: 2, 128>}]} {
    %c0 = arith.constant 0 : index
    %c0_0 = arith.constant 0 : index
    %c0_1 = arith.constant 0 : index
    %0 = vector.load %arg3[%c0, %c0_0, %c0_1] : memref<1x64x128xf32, #tpu.memory_space<vmem>>, vector<1x64x128xf32>
    %1 = vector.shape_cast %0 : vector<1x64x128xf32> to vector<64x128xf32>
    %c0_2 = arith.constant 0 : index
    %c0_3 = arith.constant 0 : index
    %2 = vector.load %arg2[%c0_2, %c0_3] : memref<2x64xf32, #tpu.memory_space<vmem>>, vector<2x64xf32>
    %cst = arith.constant dense<0.000000e+00> : vector<2x128xf32>
    %3 = tpu.matmul %2, %1, %cst {dimension_numbers = #tpu.dot_dimension_numbers<[1], [0], [0], [1], [0, 0, 1, 1], [], []>} : vector<2x64xf32>, vector<64x128xf32>, vector<2x128xf32> -> vector<2x128xf32>
    %c0_4 = arith.constant 0 : index
    %c0_5 = arith.constant 0 : index
    %c0_6 = arith.constant 0 : index
    %4 = vector.load %arg4[%c0_4, %c0_5, %c0_6] : memref<1x1x128xf32, #tpu.memory_space<vmem>>, vector<1x1x128xf32>
    %5 = vector.shape_cast %4 : vector<1x1x128xf32> to vector<1x128xf32>
    %6 = vector.broadcast %5 : vector<1x128xf32> to vector<2x128xf32>
    %7 = arith.addf %3, %6 : vector<2x128xf32>
    %c0_7 = arith.constant 0 : index
    %c0_8 = arith.constant 0 : index
    %8 = vector.load %arg5[%c0_7, %c0_8] : memref<2x128xf32, #tpu.memory_space<vmem>>, vector<2x128xf32>
    tpu.vector_store %arg5[%c0_7, %c0_8], %7 {strides = array<i32>} : memref<2x128xf32, #tpu.memory_space<vmem>>, vector<2x128xf32>,
    return
  }
  func.func @transform_0(%arg0: i32, %arg1: i32) -> (i32, i32) {
    %c0_i32 = arith.constant 0 : i32
    return %arg1, %arg0 : i32, i32
  }
  func.func @transform_1(%arg0: i32, %arg1: i32) -> (i32, i32, i32) {
    %c0_i32 = arith.constant 0 : i32
    %c0_i32_0 = arith.constant 0 : i32
    %c0_i32_1 = arith.constant 0 : i32
    return %arg0, %c0_i32, %c0_i32_0 : i32, i32, i32
  }
  func.func @transform_2(%arg0: i32, %arg1: i32) -> (i32, i32, i32) {
    %c0_i32 = arith.constant 0 : i32
    %c0_i32_0 = arith.constant 0 : i32
    %c0_i32_1 = arith.constant 0 : i32
    return %arg0, %c0_i32, %c0_i32_0 : i32, i32, i32
  }
  func.func @transform_3(%arg0: i32, %arg1: i32) -> (i32, i32) {
    %c0_i32 = arith.constant 0 : i32
    return %arg1, %arg0 : i32, i32
  }
}

</mosaic_0001>

<bundles_post_ra>
// kernel: tpu_custom_call.1
= control target key start
LH: loop header
LB: loop body
LE: loop exit
PB: predicated region body
PF: predicated region fallthrough
CT: control target
= control target key end

     0   :  { %8 = vsyncpa [#allocation3], 0  ;;  %s344_s0 = inlined_call_operand.hbm [shape: f32[2,64], index: 0, kind: input, shape index: {}]   ;;  %s345_s1 = inlined_call_operand.hbm [shape: f32[1,64,128], index: 1, kind: input, shape index: {}]   ;;  %s346_s2 = inlined_call_operand.vmem [shape: f32[1,1,128], index: 2, kind: input, shape index: {}]   ;;  %s347_s3 = inlined_call_operand.hbm [shape: f32[2,128], index: 3, kind: output, shape index: {}]  }
   0x1   :  { %9 = vsyncpa [#allocation6], 0 }
   0x2   :  { %10 = vsyncpa [#allocation4], 0  ;;  %s270_s12 = smov [#allocation2]   ;;  %s271_s14 = smov [#allocation5]  }
   0x3   :  { %s17_s13 = sshll.u32 %s270_s12, 4  ;;  %s26_s15 = sshll.u32 %s271_s14, 4  ;;  %s18_s13 = int_to_ptr.vmem [resolvable:$true] %s17_s13  ;;  %s298_s15 = int_to_ptr.vmem [resolvable:$true] %s26_s15 }
   0x4   :  { %s198_s18 = scalar_lea.hbm %s344_s0, 32 }
   0x5   :  { %p199_p0 = scmp.ne.s32.totalorder %s344_s0, %s198_s18  ;;  %p202_p1 = scmp.lt.u32.totalorder %s198_s18, %s344_s0 }
   0x7   :  { %p204_p2 = pnand %p202_p1, %p199_p0 }
   0x9   :  { %207 = shalt.err (!%p204_p2)
}
   0xa   :  { %s208_s23 = scalar_lea.vmem %s18_s13, 32  ;;  %p213_p4 = scmp.lt.s32.totalorder %s18_s13, %s18_s13 }
   0xb   :  { %p209_p3 = scmp.ne.s32.totalorder %s18_s13, %s208_s23  ;;  %p214_p5 = scmp.lt.s32.totalorder %s208_s23, %s208_s23 }
   0xd   :  { %p215_p6 = por %p214_p5, %p213_p4 }
   0xf   :  { %p216_p7 = pnand %p215_p6, %p209_p3 }
  0x11   :  { %219 = shalt.err (!%p216_p7)
}
  0x12   :  { %20 = dma.hbm_to_vmem [thread:$0]  %s344_s0, 32, %s18_s13, [#allocation3]  }
  0x13   :  { %s220_s28 = scalar_lea.hbm %s345_s1, 1024 }
  0x14   :  { %p221_p8 = scmp.ne.s32.totalorder %s345_s1, %s220_s28  ;;  %p224_p9 = scmp.lt.u32.totalorder %s220_s28, %s345_s1 }
  0x16   :  { %p226_p10 = pnand %p224_p9, %p221_p8 }
  0x18   :  { %229 = shalt.err (!%p226_p10)
}
  0x19   :  { %s230_s6 = scalar_lea.vmem %s298_s15, 1024  ;;  %p235_p12 = scmp.lt.s32.totalorder %s298_s15, %s298_s15 }
  0x1a   :  { %p231_p11 = scmp.ne.s32.totalorder %s298_s15, %s230_s6  ;;  %p236_p13 = scmp.lt.s32.totalorder %s230_s6, %s230_s6 }
  0x1c   :  { %p237_p0 = por %p236_p13, %p235_p12 }
  0x1e   :  { %p238_p1 = pnand %p237_p0, %p231_p11 }
  0x20   :  { %241 = shalt.err (!%p238_p1)
}
  0x21   :  { %s272_s0 = smov 128   ;;  %s273_s7 = smov 8  }
  0x22   :  { %32 = dma.hbm_to_vmem [thread:$0]  %s345_s1, 1024, %s298_s15, [#allocation6], %s272_s0, %s272_s0, %s273_s7  }
  0x23   :  { %264 = dma.done.wait [#allocation3], 32  }
  0x24   :  { %265 = vsyncadd [#allocation3], 4294967264 }
  0x25   :  { %266 = dma.done.wait [#allocation6], 1024  }
  0x26   :  { %267 = vsyncadd [#allocation6], 4294966272  ;;  %v274_v0 = vmov 0.0|0.0   ;;  %vm275_vm0 = vmmov 0   ;;  %v276_v1 = vmov 0.0   ;;  %v41_v2 = vld [vmem:[#allocation5] sm:$0xff] }
  0x27   :  { %178 = vmatprep.subr.bf16.mxu0 %v274_v0  ;;  %175 = vmatprep.mubr.msk.f32.mxu0 %vm275_vm0, %v276_v1  ;;  %v42_v3 = vld [vmem:[#allocation5 + $0x8] sm:$0xff]  ;;  %v43_v4 = vld [vmem:[#allocation5 + $0x10] sm:$0xff]  ;;  %v44_v6 = vld [vmem:[#allocation5 + $0x18] sm:$0xff]  ;;  %vm57_vm1 = vcmask 523264   ;;  %s277_s11 = smov [#allocation7]  }
  0x28   :  { %v179_v5 = vpack.c.bf16 %v42_v3, %v41_v2  ;;  %v182_v7 = vpack.c.bf16 %v44_v6, %v43_v4  ;;  %v45_v8 = vld [vmem:[#allocation5 + $0x20] sm:$0xff]  ;;  %v46_v9 = vld [vmem:[#allocation5 + $0x28] sm:$0xff]  ;;  %v47_v11 = vld [vmem:[#allocation5 + $0x30] sm:$0xff]  ;;  %s138_s12 = sshll.u32 %s277_s11, 4  ;;  %s139_s12 = int_to_ptr.vmem [resolvable:$true] %s138_s12 }
  0x29   :  { %v185_v10 = vpack.c.bf16 %v46_v9, %v45_v8  ;;  %v48_v12 = vld [vmem:[#allocation5 + $0x38] sm:$0xff]  ;;  %s242_s13 = scalar_lea.vmem %s139_s12, 32  ;;  %p247_p3 = scmp.lt.s32.totalorder %s139_s12, %s139_s12 }
  0x2a   :  { %180 = vmatpush3.bf16.msra.mxu0 %v179_v5  ;;  %v188_v13 = vpack.c.bf16 %v48_v12, %v47_v11  ;;  %v49_v14 = vld [vmem:[#allocation2] sm:$0x3]  ;;  %p243_p2 = scmp.ne.s32.totalorder %s139_s12, %s242_s13  ;;  %p248_p4 = scmp.lt.s32.totalorder %s242_s13, %s242_s13 }
  0x2b   :  { %181 = vmatprep.subr.bf16.mxu0 %v274_v0  ;;  %v148_v15 = vld [vmem:[%s346_s2] ss:$0 sm:$0xff] }
  0x2c   :  { %p249_p5 = por %p248_p4, %p247_p3 }
  0x2e   :  { %183 = vmatpush3.bf16.msra.mxu0 %v182_v7  ;;  %p250_p6 = pnand %p249_p5, %p243_p2 }
  0x2f   :  { %184 = vmatprep.subr.bf16.mxu0 %v274_v0 }
  0x32   :  { %186 = vmatpush3.bf16.msra.mxu0 %v185_v10 }
  0x33   :  { %187 = vmatprep.subr.bf16.mxu0 %v274_v0 }
  0x36   :  { %189 = vmatpush3.bf16.msra.mxu0 %v188_v13 }
  0x39   :  { %176 = vmatmul.mubr.msk.f32.vlgmr.msra.gmra.mrb[0].mxu0 %vm57_vm1, %v49_v14 }
 0x10c   :  { %v127_v16 = vpop.f32.mrb[0].mxu0 }
 0x10d   :  { %v128_v17 = vadd.f32 %v148_v15, %v127_v16  ;;  %v177_v18 = vpop.f32.mrb[1].mxu0 }
 0x10f   :  { %131 = vst [vmem:[#allocation7] sm:$0x3] %v128_v17 }
 0x110   :  { %253 = shalt.err (!%p250_p6)
}
 0x111   :  { %s254_s16 = scalar_lea.hbm %s347_s3, 32 }
 0x112   :  { %p255_p7 = scmp.ne.s32.totalorder %s347_s3, %s254_s16  ;;  %p258_p8 = scmp.lt.u32.totalorder %s254_s16, %s347_s3 }
 0x114   :  { %p260_p9 = pnand %p258_p8, %p255_p7 }
 0x116   :  { %263 = shalt.err (!%p260_p9)
}
 0x117   :  { %141 = dma.vmem_to_hbm [thread:$0]  %s139_s12, 32, %s347_s3, [#allocation4]  }
 0x118   :  { %268 = dma.done.wait [#allocation4], 32  }
 0x119   :  { %269 = vsyncadd [#allocation4], 4294967264 }
 0x11a   :  { %145 = vsyncpa [#allocation3], 1 }
 0x11b   :  { %146 = vsyncpa [#allocation6], 1 }
 0x11c   :  { %147 = vsyncpa [#allocation4], 1 }

</bundles_post_ra>
